<compile_context>
chip_gen: v7x
topology: tpu7x:2x2x1
jax: 0.10.0
libtpu: 0.0.40
codegen_flags: <defaults>
</compile_context>

<pallas_src>
import jax
import jax.numpy as jnp
from jax.experimental import pallas as pl
from jax.experimental.pallas import tpu as pltpu

NEG_SLOPE = 0.01   # nn.LeakyReLU() default negative_slope
N_OUT = 2          # fc2: Linear(128, 2)
D_IN = 128

# Largest tile first; 16384 f32 rows = 8 MiB per x buffer, 16 MiB double-buffered.
_TILE_CANDIDATES = (16384, 8192, 4096, 2048, 1024, 512, 256, 128)


def head11_kernel(x_ref, wt_ref, b_ref, o_ref):
    # x_ref: (TB, 128)   wt_ref: (128, 2)   b_ref: (1, 2)   o_ref: (TB, 2)
    # Canonical [M,K] @ [K,N] MXU matmul: no transpose of the big x tile.
    y = jnp.dot(x_ref[...], wt_ref[...], preferred_element_type=jnp.float32)
    y = y + b_ref[...]                        # (1, 2) broadcast over rows
    y = jnp.where(y > 0, y, NEG_SLOPE * y)    # LeakyReLU
    # TODO(synk): training-mode Dropout (p=0.5) would use pltpu.prng_seed +
    # pltpu.stateful_bernoulli; eval-mode dropout is the identity.
    o_ref[...] = y.astype(o_ref.dtype)


def _round_up(n, m):
    return ((n + m - 1) // m) * m


def _pick_tile(B):
    """Return (tile_rows, padded_batch).

    The batch is always padded to a multiple of the tile so the grid is
    multi-step (pipelined / megacore-shardable); padding waste <= 12.5%.
    """
    b128 = _round_up(B, 128)
    for tb in _TILE_CANDIDATES:
        if tb > b128:
            continue
        padded = _round_up(b128, tb)
        if (padded - b128) * 8 <= b128:     # at most 12.5% extra padding
            return tb, padded
    return 128, b128                        # b128 is a multiple of 128: 0% extra


def head11_forward(x, w, b):
    """x: (B, 128), w: (2, 128)  [nn.Linear layout], b: (2,)  ->  (B, 2)."""
    B, D = x.shape
    assert D == D_IN
    assert w.shape == (N_OUT, D_IN)

    tb, b_pad = _pick_tile(B)
    x_p = jnp.pad(x, ((0, b_pad - B), (0, 0))) if b_pad != B else x
    grid = (b_pad // tb,)

    w_t = jnp.transpose(w)                  # (128, 2), resident across grid steps
    b2 = b.reshape(1, N_OUT)

    itemsize = jnp.dtype(x.dtype).itemsize
    # Double-buffered x + out tiles plus the tiny resident weight/bias blocks.
    vmem_bytes = (2 * tb * (D_IN + N_OUT) * itemsize
                  + 2 * (D_IN * N_OUT + N_OUT) * itemsize)
    # >= 32 MiB covers v5e's 16 MiB scoped default at the big tile sizes;
    # <= 48 MiB leaves headroom inside v7x's 64 MiB physical VMEM.
    vmem_limit = int(min(48 * 1024 * 1024,
                         max(32 * 1024 * 1024, vmem_bytes + (4 << 20))))

    out = pl.pallas_call(
        head11_kernel,
        out_shape=jax.ShapeDtypeStruct((b_pad, N_OUT), x.dtype),
        grid_spec=pltpu.PrefetchScalarGridSpec(
            num_scalar_prefetch=0,
            grid=grid,
            in_specs=[
                pl.BlockSpec((tb, D_IN), lambda i: (i, 0)),      # x tile
                pl.BlockSpec((D_IN, N_OUT), lambda i: (0, 0)),   # w.T  (resident)
                pl.BlockSpec((1, N_OUT), lambda i: (0, 0)),      # bias (resident)
            ],
            out_specs=pl.BlockSpec((tb, N_OUT), lambda i: (i, 0)),
        ),
        compiler_params=pltpu.CompilerParams(
            # Rows are independent (no carried state) -> shardable across the
            # two TensorCores on v7x; near-zero effect on single-TC v5e/v6e.
            dimension_semantics=("parallel",),
            vmem_limit_bytes=vmem_limit),
        cost_estimate=pl.CostEstimate(
            flops=2 * b_pad * D_IN * N_OUT,
            transcendentals=0,
            bytes_accessed=(b_pad * D_IN + b_pad * N_OUT
                            + D_IN * N_OUT + N_OUT) * itemsize),
    )(x_p, w_t, b2)

    return out[:B] if b_pad != B else out


def reference_forward(x, w, b):
    y = x @ w.T + b.reshape(1, N_OUT)
    return jnp.where(y > 0, y, NEG_SLOPE * y)


if __name__ == "__main__":
    key = jax.random.PRNGKey(0)
    kx, kw, kb = jax.random.split(key, 3)

    B = 8
    x = jax.random.normal(kx, (B, D_IN), dtype=jnp.float32)

    # nn.Linear default init: U(-1/sqrt(fan_in), 1/sqrt(fan_in))
    bound = 1.0 / jnp.sqrt(jnp.float32(D_IN))
    w = jax.random.uniform(kw, (N_OUT, D_IN), minval=-bound, maxval=bound,
                           dtype=jnp.float32)
    b = jax.random.uniform(kb, (N_OUT,), minval=-bound, maxval=bound,
                           dtype=jnp.float32)

    out = head11_forward(x, w, b)
    jax.block_until_ready(out)

    ref = reference_forward(x, w, b)
    assert out.shape == (B, N_OUT)
    assert jnp.allclose(out, ref, atol=1e-5, rtol=1e-5)

    print("KERNEL_OK")
</pallas_src>

<mosaic_0001>
module attributes {stable_mosaic.version = 11 : i64} {
  func.func @head11_kernel(%arg0: i32, %arg1: memref<128x128xf32, #tpu.memory_space<vmem>>, %arg2: memref<128x2xf32, #tpu.memory_space<vmem>>, %arg3: memref<1x2xf32, #tpu.memory_space<vmem>>, %arg4: memref<128x2xf32, #tpu.memory_space<vmem>>) attributes {dimension_semantics = [#tpu.dimension_semantics<parallel>], iteration_bounds = array<i64: 1>, scalar_prefetch = 0 : i64, scratch_operands = 0 : i64, tpu.core_type = #tpu.core_type<tc>, window_params = [{transform_indices = @transform_0, window_bounds = array<i64: 128, 128>}, {pipeline_mode = #tpu.pipeline_mode<synchronous>, transform_indices = @transform_1, window_bounds = array<i64: 128, 2>}, {pipeline_mode = #tpu.pipeline_mode<synchronous>, transform_indices = @transform_2, window_bounds = array<i64: 1, 2>}, {transform_indices = @transform_3, window_bounds = array<i64: 128, 2>}]} {
    %c0 = arith.constant 0 : index
    %c0_0 = arith.constant 0 : index
    %0 = vector.load %arg1[%c0, %c0_0] : memref<128x128xf32, #tpu.memory_space<vmem>>, vector<128x128xf32>
    %c0_1 = arith.constant 0 : index
    %c0_2 = arith.constant 0 : index
    %1 = vector.load %arg2[%c0_1, %c0_2] : memref<128x2xf32, #tpu.memory_space<vmem>>, vector<128x2xf32>
    %cst = arith.constant dense<0.000000e+00> : vector<128x2xf32>
    %2 = tpu.matmul %0, %1, %cst {dimension_numbers = #tpu.dot_dimension_numbers<[1], [0], [0], [1], [0, 0, 1, 1], [], []>} : vector<128x128xf32>, vector<128x2xf32>, vector<128x2xf32> -> vector<128x2xf32>
    %c0_3 = arith.constant 0 : index
    %c0_4 = arith.constant 0 : index
    %3 = vector.load %arg3[%c0_3, %c0_4] : memref<1x2xf32, #tpu.memory_space<vmem>>, vector<1x2xf32>
    %4 = vector.broadcast %3 : vector<1x2xf32> to vector<128x2xf32>
    %5 = arith.addf %2, %4 : vector<128x2xf32>
    %cst_5 = arith.constant 0.000000e+00 : f32
    %6 = vector.broadcast %cst_5 : f32 to vector<128x2xf32>
    %7 = arith.cmpf ogt, %5, %6 : vector<128x2xf32>
    %cst_6 = arith.constant 0.00999999977 : f32
    %8 = vector.broadcast %cst_6 : f32 to vector<128x2xf32>
    %9 = arith.mulf %8, %5 : vector<128x2xf32>
    %10 = arith.select %7, %5, %9 : vector<128x2xi1>, vector<128x2xf32>
    %c0_7 = arith.constant 0 : index
    %c0_8 = arith.constant 0 : index
    %11 = vector.load %arg4[%c0_7, %c0_8] : memref<128x2xf32, #tpu.memory_space<vmem>>, vector<128x2xf32>
    tpu.vector_store %arg4[%c0_7, %c0_8], %10 {strides = array<i32>} : memref<128x2xf32, #tpu.memory_space<vmem>>, vector<128x2xf32>,
    return
  }
  func.func @transform_0(%arg0: i32) -> (i32, i32) {
    %c0_i32 = arith.constant 0 : i32
    %c0_i32_0 = arith.constant 0 : i32
    return %arg0, %c0_i32 : i32, i32
  }
  func.func @transform_1(%arg0: i32) -> (i32, i32) {
    %c0_i32 = arith.constant 0 : i32
    %c0_i32_0 = arith.constant 0 : i32
    %c0_i32_1 = arith.constant 0 : i32
    return %c0_i32, %c0_i32_0 : i32, i32
  }
  func.func @transform_2(%arg0: i32) -> (i32, i32) {
    %c0_i32 = arith.constant 0 : i32
    %c0_i32_0 = arith.constant 0 : i32
    %c0_i32_1 = arith.constant 0 : i32
    return %c0_i32, %c0_i32_0 : i32, i32
  }
  func.func @transform_3(%arg0: i32) -> (i32, i32) {
    %c0_i32 = arith.constant 0 : i32
    %c0_i32_0 = arith.constant 0 : i32
    return %arg0, %c0_i32 : i32, i32
  }
}

</mosaic_0001>

<bundles_post_ra>
// kernel: tpu_custom_call.1
= control target key start
LH: loop header
LB: loop body
LE: loop exit
PB: predicated region body
PF: predicated region fallthrough
CT: control target
= control target key end

     0   :  { %vm246_vm0 = vcmask 15360   ;;  %s605_s1 = inlined_call_operand.vmem [shape: f32[128,2], index: 1, kind: input, shape index: {}]   ;;  %s606_s0 = inlined_call_operand.vmem [shape: f32[128,128], index: 0, kind: input, shape index: {}]   ;;  %s607_s2 = inlined_call_operand.vmem [shape: f32[1,2], index: 2, kind: input, shape index: {}]   ;;  %s608_s3 = inlined_call_operand.vmem [shape: f32[128,2], index: 3, kind: output, shape index: {}]  }
   0x1   :  { %v30_v0 = vld [vmem:[%s605_s1] sm:$0xff]  ;;  %v31_v1 = vld [vmem:[%s605_s1 + $0x8] sm:$0xff]  ;;  %v32_v2 = vld [vmem:[%s605_s1 + $0x10] sm:$0xff] }
   0x2   :  { %v356_v3 = vpack.c.bf16 %v31_v1, %v30_v0  ;;  %v33_v4 = vld [vmem:[%s605_s1 + $0x18] sm:$0xff]  ;;  %v34_v6 = vld [vmem:[%s605_s1 + $0x20] sm:$0xff]  ;;  %v35_v7 = vld [vmem:[%s605_s1 + $0x28] sm:$0xff] }
   0x3   :  { %v360_v5 = vpack.c.bf16 %v33_v4, %v32_v2  ;;  %v364_v8 = vpack.c.bf16 %v35_v7, %v34_v6  ;;  %v14_v9 = vld [vmem:[%s606_s0] sm:$0xff]  ;;  %v36_v11 = vld [vmem:[%s605_s1 + $0x30] sm:$0xff]  ;;  %v37_v12 = vld [vmem:[%s605_s1 + $0x38] sm:$0xff] }
   0x4   :  { %357 = vmatprep.subr.bf16.mxu0 %v356_v3  ;;  %388 = vmatprep.subr.bf16.mxu1 %v356_v3  ;;  %v22_v10 = vld [vmem:[%s606_s0 + $0x40] sm:$0xff]  ;;  %v368_v13 = vpack.c.bf16 %v37_v12, %v36_v11  ;;  %v39_v15 = vld [vmem:[%s605_s1 + $0x48] sm:$0xff]  ;;  %v40_v17 = vld [vmem:[%s605_s1 + $0x50] sm:$0xff] }
   0x5   :  { %359 = vmatpush3.bf16.msra.mxu0 %v356_v3  ;;  %396 = vmatpush3.bf16.msra.mxu1 %v356_v3  ;;  %v38_v14 = vld [vmem:[%s605_s1 + $0x40] sm:$0xff]  ;;  %v41_v18 = vld [vmem:[%s605_s1 + $0x58] sm:$0xff]  ;;  %v43_v21 = vld [vmem:[%s605_s1 + $0x68] sm:$0xff] }
   0x6   :  { %361 = vmatprep.subr.bf16.mxu0 %v360_v5  ;;  %389 = vmatprep.subr.bf16.mxu1 %v360_v5  ;;  %v372_v16 = vpack.c.bf16 %v39_v15, %v38_v14  ;;  %v376_v19 = vpack.c.bf16 %v41_v18, %v40_v17  ;;  %v42_v20 = vld [vmem:[%s605_s1 + $0x60] sm:$0xff]  ;;  %v44_v23 = vld [vmem:[%s605_s1 + $0x70] sm:$0xff]  ;;  %v45_v24 = vld [vmem:[%s605_s1 + $0x78] sm:$0xff] }
   0x7   :  { %332 = vmatprep.mubr.f32.mxu0 %v14_v9  ;;  %344 = vmatprep.mubr.f32.mxu1 %v22_v10  ;;  %v380_v22 = vpack.c.bf16 %v43_v21, %v42_v20  ;;  %v384_v25 = vpack.c.bf16 %v45_v24, %v44_v23  ;;  %v15_v26 = vld [vmem:[%s606_s0 + $0x8] sm:$0xff]  ;;  %v16_v28 = vld [vmem:[%s606_s0 + $0x10] sm:$0xff]  ;;  %v17_v30 = vld [vmem:[%s606_s0 + $0x18] sm:$0xff] }
   0x8   :  { %v23_v27 = vld [vmem:[%s606_s0 + $0x48] sm:$0xff]  ;;  %v24_v29 = vld [vmem:[%s606_s0 + $0x50] sm:$0xff]  ;;  %v25_v31 = vld [vmem:[%s606_s0 + $0x58] sm:$0xff] }
   0x9   :  { %363 = vmatpush3.bf16.msra.mxu0 %v360_v5  ;;  %397 = vmatpush3.bf16.msra.mxu1 %v360_v5  ;;  %v18_v32 = vld [vmem:[%s606_s0 + $0x20] sm:$0xff]  ;;  %v19_v34 = vld [vmem:[%s606_s0 + $0x28] sm:$0xff]  ;;  %v20_v36 = vld [vmem:[%s606_s0 + $0x30] sm:$0xff] }
   0xa   :  { %365 = vmatprep.subr.bf16.mxu0 %v364_v8  ;;  %390 = vmatprep.subr.bf16.mxu1 %v364_v8  ;;  %v26_v33 = vld [vmem:[%s606_s0 + $0x60] sm:$0xff]  ;;  %v27_v35 = vld [vmem:[%s606_s0 + $0x68] sm:$0xff]  ;;  %v28_v37 = vld [vmem:[%s606_s0 + $0x70] sm:$0xff] }
   0xb   :  { %v21_v38 = vld [vmem:[%s606_s0 + $0x38] sm:$0xff]  ;;  %v523_v40 = vld [vmem:[%s607_s2] ss:$0 sm:$0xff] }
   0xc   :  { %v29_v39 = vld [vmem:[%s606_s0 + $0x78] sm:$0xff] }
   0xd   :  { %367 = vmatpush3.bf16.msra.mxu0 %v364_v8  ;;  %398 = vmatpush3.bf16.msra.mxu1 %v364_v8 }
   0xe   :  { %369 = vmatprep.subr.bf16.mxu0 %v368_v13  ;;  %391 = vmatprep.subr.bf16.mxu1 %v368_v13 }
  0x11   :  { %371 = vmatpush3.bf16.msra.mxu0 %v368_v13  ;;  %399 = vmatpush3.bf16.msra.mxu1 %v368_v13 }
  0x12   :  { %373 = vmatprep.subr.bf16.mxu0 %v372_v16  ;;  %392 = vmatprep.subr.bf16.mxu1 %v372_v16 }
  0x15   :  { %375 = vmatpush3.bf16.msra.mxu0 %v372_v16  ;;  %400 = vmatpush3.bf16.msra.mxu1 %v372_v16 }
  0x16   :  { %377 = vmatprep.subr.bf16.mxu0 %v376_v19  ;;  %393 = vmatprep.subr.bf16.mxu1 %v376_v19 }
  0x19   :  { %379 = vmatpush3.bf16.msra.mxu0 %v376_v19  ;;  %401 = vmatpush3.bf16.msra.mxu1 %v376_v19 }
  0x1a   :  { %381 = vmatprep.subr.bf16.mxu0 %v380_v22  ;;  %394 = vmatprep.subr.bf16.mxu1 %v380_v22 }
  0x1d   :  { %383 = vmatpush3.bf16.msra.mxu0 %v380_v22  ;;  %402 = vmatpush3.bf16.msra.mxu1 %v380_v22 }
  0x1e   :  { %385 = vmatprep.subr.bf16.mxu0 %v384_v25  ;;  %395 = vmatprep.subr.bf16.mxu1 %v384_v25 }
  0x21   :  { %387 = vmatpush3.bf16.msra.mxu0 %v384_v25  ;;  %403 = vmatpush3.bf16.msra.mxu1 %v384_v25 }
  0x24   :  { %333 = vmatmul.mubr.f32.vlgmr.msra.gmra.mrb[0].mxu0 %v15_v26  ;;  %345 = vmatmul.mubr.f32.vlgmr.msra.gmra.mrb[0].mxu1 %v23_v27 }
  0x25   :  { %335 = vmatprep.mubr.f32.mxu0 %v16_v28  ;;  %347 = vmatprep.mubr.f32.mxu1 %v24_v29 }
  0x28   :  { %336 = vmatmul.mubr.f32.gmra.mrb[2].mxu0 %v17_v30  ;;  %348 = vmatmul.mubr.f32.gmra.mrb[2].mxu1 %v25_v31 }
  0x29   :  { %338 = vmatprep.mubr.f32.mxu0 %v18_v32  ;;  %350 = vmatprep.mubr.f32.mxu1 %v26_v33 }
  0x2c   :  { %339 = vmatmul.mubr.f32.gmra.mrb[4].mxu0 %v19_v34  ;;  %351 = vmatmul.mubr.f32.gmra.mrb[4].mxu1 %v27_v35 }
  0x2d   :  { %341 = vmatprep.mubr.f32.mxu0 %v20_v36  ;;  %353 = vmatprep.mubr.f32.mxu1 %v28_v37 }
  0x30   :  { %342 = vmatmul.mubr.f32.gmra.mrb[6].mxu0 %v21_v38  ;;  %354 = vmatmul.mubr.f32.gmra.mrb[6].mxu1 %v29_v39 }
  0xf7   :  { %v334_v41 = vpop.f32.mrb[0].mxu0  ;;  %v346_v42 = vpop.f32.mrb[0].mxu1 }
  0xf8   :  { %v125_v43 = vadd.f32 %v334_v41, %v523_v40  ;;  %v165_v44 = vadd.f32 %v346_v42, %v523_v40  ;;  %v119_v45 = vpop.f32.mrb[1].mxu0  ;;  %v159_v46 = vpop.f32.mrb[1].mxu1 }
  0xf9   :  { %v120_v47 = vadd.f32 %v523_v40, %v119_v45  ;;  %v160_v48 = vadd.f32 %v523_v40, %v159_v46 }
  0xfa   :  { %vm199_vm1 = vcmp.gt.f32.partialorder %v125_v43, 0.0  ;;  %v215_v49 = vmul.f32 0.01, %v125_v43  ;;  %vm207_vm2 = vcmp.gt.f32.partialorder %v165_v44, 0.0  ;;  %v223_v50 = vmul.f32 0.01, %v165_v44 }
  0xfb   :  { %vm198_vm3 = vcmp.gt.f32.partialorder %v120_v47, 0.0  ;;  %v214_v51 = vmul.f32 0.01, %v120_v47  ;;  %vm206_vm4 = vcmp.gt.f32.partialorder %v160_v48, 0.0  ;;  %v222_v52 = vmul.f32 0.01, %v160_v48 }
  0xfc   :  { %v231_v53 = vsel %vm199_vm1, %v125_v43, %v215_v49  ;;  %v239_v54 = vsel %vm207_vm2, %v165_v44, %v223_v50  ;;  %v337_v55 = vpop.f32.mrb[2].mxu0  ;;  %v349_v56 = vpop.f32.mrb[2].mxu1 }
  0xfd   :  { %248 = vst.msk [vmem:[%s608_s3 + $0x8] sm:$0xff] %vm246_vm0, %v231_v53  ;;  %256 = vst.msk [vmem:[%s608_s3 + $0x48] sm:$0xff] %vm246_vm0, %v239_v54  ;;  %v230_v57 = vsel %vm198_vm3, %v120_v47, %v214_v51  ;;  %v238_v58 = vsel %vm206_vm4, %v160_v48, %v222_v52  ;;  %v135_v59 = vadd.f32 %v337_v55, %v523_v40  ;;  %v129_v61 = vpop.f32.mrb[3].mxu0  ;;  %v169_v62 = vpop.f32.mrb[3].mxu1 }
  0xfe   :  { %v175_v60 = vadd.f32 %v349_v56, %v523_v40  ;;  %247 = vst.msk [vmem:[%s608_s3] sm:$0xff] %vm246_vm0, %v230_v57  ;;  %255 = vst.msk [vmem:[%s608_s3 + $0x40] sm:$0xff] %vm246_vm0, %v238_v58  ;;  %v130_v63 = vadd.f32 %v523_v40, %v129_v61  ;;  %v170_v0 = vadd.f32 %v523_v40, %v169_v62 }
  0xff   :  { %vm201_vm5 = vcmp.gt.f32.partialorder %v135_v59, 0.0  ;;  %v217_v1 = vmul.f32 0.01, %v135_v59  ;;  %v340_v7 = vpop.f32.mrb[4].mxu0  ;;  %v352_v8 = vpop.f32.mrb[4].mxu1 }
 0x100   :  { %vm209_vm6 = vcmp.gt.f32.partialorder %v175_v60, 0.0  ;;  %v225_v2 = vmul.f32 0.01, %v175_v60  ;;  %vm200_vm7 = vcmp.gt.f32.partialorder %v130_v63, 0.0  ;;  %v216_v3 = vmul.f32 0.01, %v130_v63 }
 0x101   :  { %vm208_vm8 = vcmp.gt.f32.partialorder %v170_v0, 0.0  ;;  %v224_v4 = vmul.f32 0.01, %v170_v0  ;;  %v233_v5 = vsel %vm201_vm5, %v135_v59, %v217_v1  ;;  %v145_v11 = vadd.f32 %v340_v7, %v523_v40  ;;  %v139_v13 = vpop.f32.mrb[5].mxu0  ;;  %v179_v14 = vpop.f32.mrb[5].mxu1 }
 0x102   :  { %v241_v6 = vsel %vm209_vm6, %v175_v60, %v225_v2  ;;  %250 = vst.msk [vmem:[%s608_s3 + $0x18] sm:$0xff] %vm246_vm0, %v233_v5  ;;  %v232_v9 = vsel %vm200_vm7, %v130_v63, %v216_v3  ;;  %v185_v12 = vadd.f32 %v352_v8, %v523_v40  ;;  %v140_v15 = vadd.f32 %v523_v40, %v139_v13 }
 0x103   :  { %258 = vst.msk [vmem:[%s608_s3 + $0x58] sm:$0xff] %vm246_vm0, %v241_v6  ;;  %v240_v10 = vsel %vm208_vm8, %v170_v0, %v224_v4  ;;  %249 = vst.msk [vmem:[%s608_s3 + $0x10] sm:$0xff] %vm246_vm0, %v232_v9  ;;  %v180_v16 = vadd.f32 %v523_v40, %v179_v14  ;;  %v343_v17 = vpop.f32.mrb[6].mxu0  ;;  %v355_v18 = vpop.f32.mrb[6].mxu1  ;;  %vm203_vm9 = vcmp.gt.f32.partialorder %v145_v11, 0.0 }
 0x104   :  { %257 = vst.msk [vmem:[%s608_s3 + $0x50] sm:$0xff] %vm246_vm0, %v240_v10  ;;  %v219_v19 = vmul.f32 0.01, %v145_v11  ;;  %vm211_vm10 = vcmp.gt.f32.partialorder %v185_v12, 0.0  ;;  %v227_v20 = vmul.f32 0.01, %v185_v12  ;;  %v155_v25 = vadd.f32 %v343_v17, %v523_v40 }
 0x105   :  { %vm202_vm11 = vcmp.gt.f32.partialorder %v140_v15, 0.0  ;;  %v218_v21 = vmul.f32 0.01, %v140_v15  ;;  %vm210_vm12 = vcmp.gt.f32.partialorder %v180_v16, 0.0  ;;  %v226_v22 = vmul.f32 0.01, %v180_v16 }
 0x106   :  { %v235_v23 = vsel %vm203_vm9, %v145_v11, %v219_v19  ;;  %v243_v24 = vsel %vm211_vm10, %v185_v12, %v227_v20  ;;  %v195_v26 = vadd.f32 %v355_v18, %v523_v40  ;;  %v149_v27 = vpop.f32.mrb[7].mxu0  ;;  %v189_v28 = vpop.f32.mrb[7].mxu1  ;;  %vm205_vm13 = vcmp.gt.f32.partialorder %v155_v25, 0.0 }
 0x107   :  { %252 = vst.msk [vmem:[%s608_s3 + $0x28] sm:$0xff] %vm246_vm0, %v235_v23  ;;  %260 = vst.msk [vmem:[%s608_s3 + $0x68] sm:$0xff] %vm246_vm0, %v243_v24  ;;  %v234_v29 = vsel %vm202_vm11, %v140_v15, %v218_v21  ;;  %v242_v30 = vsel %vm210_vm12, %v180_v16, %v226_v22  ;;  %v150_v31 = vadd.f32 %v523_v40, %v149_v27  ;;  %v221_v33 = vmul.f32 0.01, %v155_v25 }
 0x108   :  { %v190_v32 = vadd.f32 %v523_v40, %v189_v28  ;;  %251 = vst.msk [vmem:[%s608_s3 + $0x20] sm:$0xff] %vm246_vm0, %v234_v29  ;;  %259 = vst.msk [vmem:[%s608_s3 + $0x60] sm:$0xff] %vm246_vm0, %v242_v30  ;;  %vm213_vm14 = vcmp.gt.f32.partialorder %v195_v26, 0.0  ;;  %v229_v34 = vmul.f32 0.01, %v195_v26 }
 0x109   :  { %vm204_vm15 = vcmp.gt.f32.partialorder %v150_v31, 0.0  ;;  %v220_v35 = vmul.f32 0.01, %v150_v31  ;;  %v237_v37 = vsel %vm205_vm13, %v155_v25, %v221_v33 }
 0x10a   :  { %vm212_vm1 = vcmp.gt.f32.partialorder %v190_v32, 0.0  ;;  %v228_v36 = vmul.f32 0.01, %v190_v32  ;;  %v245_v38 = vsel %vm213_vm14, %v195_v26, %v229_v34  ;;  %254 = vst.msk [vmem:[%s608_s3 + $0x38] sm:$0xff] %vm246_vm0, %v237_v37 }
 0x10b   :  { %262 = vst.msk [vmem:[%s608_s3 + $0x78] sm:$0xff] %vm246_vm0, %v245_v38  ;;  %v236_v39 = vsel %vm204_vm15, %v150_v31, %v220_v35 }
 0x10c   :  { %v244_v40 = vsel %vm212_vm1, %v190_v32, %v228_v36  ;;  %253 = vst.msk [vmem:[%s608_s3 + $0x30] sm:$0xff] %vm246_vm0, %v236_v39 }
 0x10d   :  { %261 = vst.msk [vmem:[%s608_s3 + $0x70] sm:$0xff] %vm246_vm0, %v244_v40 }

</bundles_post_ra>
